<compile_context>
chip_gen: v7x
topology: tpu7x:2x2x1
jax: 0.10.0
libtpu: 0.0.40
codegen_flags: <defaults>
</compile_context>

<pallas_src>
import functools

import jax
import jax.numpy as jnp
from jax import lax
from jax.experimental import pallas as pl
from jax.experimental.pallas import tpu as pltpu


_VMEM_LIMIT = 48 * 1024 * 1024  # fits v5e/v6e (128 MiB) and v7x (64 MiB) VMEM
_HIGHEST = lax.Precision.HIGHEST


def _pick_tile(dim, target, align):
    """Largest divisor of `dim` that is <= target and a multiple of `align`.

    Falls back to the full dimension (always a legal Mosaic block) only when
    no aligned divisor exists -- avoids the old "whole dimension" fallback
    that killed pipelining for awkward sizes.
    """
    target = min(dim, target)
    for t in range(target, 0, -1):
        if dim % t == 0 and t % align == 0:
            return t
    return dim


# ---------------------------------------------------------------------------
# Kernel 1: tiled linear projection  y = x @ W + b   (bf16 MXU, f32 accumulate)
# ---------------------------------------------------------------------------
def _matmul_bias_kernel(x_ref, w_ref, b_ref, o_ref, acc_ref):
    @pl.when(pl.program_id(2) == 0)
    def _():
        acc_ref[...] = jnp.zeros_like(acc_ref)

    acc_ref[...] += jnp.dot(
        x_ref[...].astype(jnp.bfloat16),
        w_ref[...].astype(jnp.bfloat16),
        preferred_element_type=jnp.float32,
    )

    @pl.when(pl.program_id(2) == pl.num_programs(2) - 1)
    def _():
        o_ref[...] = (acc_ref[...] + b_ref[...]).astype(o_ref.dtype)


def linear(x2d, w, b, *, tm=256, tn=512, tk=512):
    # x2d: (M, K) f32, w: (K, N) bf16, b: (1, N) f32
    M, K = x2d.shape
    N = w.shape[1]
    tm = _pick_tile(M, tm, 8)
    tn = _pick_tile(N, tn, 128)
    tk = _pick_tile(K, tk, 128)
    grid = (M // tm, N // tn, K // tk)
    return pl.pallas_call(
        _matmul_bias_kernel,
        grid=grid,
        in_specs=[
            pl.BlockSpec((tm, tk), lambda i, j, kk: (i, kk)),
            pl.BlockSpec((tk, tn), lambda i, j, kk: (kk, j)),
            pl.BlockSpec((1, tn), lambda i, j, kk: (0, j)),
        ],
        out_specs=pl.BlockSpec((tm, tn), lambda i, j, kk: (i, j)),
        out_shape=jax.ShapeDtypeStruct((M, N), jnp.float32),
        scratch_shapes=[pltpu.VMEM((tm, tn), jnp.float32)],
        compiler_params=pltpu.CompilerParams(
            dimension_semantics=("parallel", "parallel", "arbitrary"),
            vmem_limit_bytes=_VMEM_LIMIT,
        ),
    )(x2d, w, b)


# ---------------------------------------------------------------------------
# Kernel 2: scaled dot-product attention
#   attn = softmax(softmax((q @ k^T) / temperature))  [double softmax, as in
#   the reference module], output = attn @ v
#   Grid over (batch, q-tile); heads unrolled in-register; attn written
#   directly in the PyTorch (n_head, sz_b, len_q, len_k) layout.
# ---------------------------------------------------------------------------
def _attention_kernel(q_ref, k_ref, v_ref, o_ref, attn_ref, *,
                      n_head, d_k, d_v, inv_temp):
    # q_ref: (1, tq, n_head*d_k); k_ref: (1, len_k, n_head*d_k);
    # v_ref: (1, len_k, n_head*d_v)
    q = (q_ref[0] * inv_temp).astype(jnp.bfloat16)   # fold 1/temperature into q
    k = k_ref[0].astype(jnp.bfloat16)
    v = v_ref[0].astype(jnp.bfloat16)

    for h in range(n_head):   # heads in-register: static slices, no HBM moves
        qh = q[:, h * d_k:(h + 1) * d_k]
        kh = k[:, h * d_k:(h + 1) * d_k]
        vh = v[:, h * d_v:(h + 1) * d_v]

        # scores: contract last axes (no explicit k.T); bf16 in, f32 accumulate
        s = lax.dot_general(qh, kh, (((1,), (1,)), ((), ())),
                            preferred_element_type=jnp.float32)

        # softmax #1 along the key axis (exact division: attn is returned)
        e1 = jnp.exp(s - jnp.max(s, axis=-1, keepdims=True))
        p1 = e1 / jnp.sum(e1, axis=-1, keepdims=True)

        # softmax #2 (the reference module applies softmax twice). p1 is in
        # [0,1] so the max-subtraction is dropped (cancels in normalization).
        e2 = jnp.exp(p1)
        p2 = e2 / jnp.sum(e2, axis=-1, keepdims=True)

        attn_ref[h, 0] = p2   # already in (n_head, sz_b, len_q, len_k) layout
        o_ref[0, :, h * d_v:(h + 1) * d_v] = jnp.dot(
            p2.astype(jnp.bfloat16), vh, preferred_element_type=jnp.float32)


def attention(qh, kh, vh, *, n_head, d_k, d_v, temperature):
    # qh: (sz_b, len_q, n_head*d_k), kh: (sz_b, len_k, n_head*d_k),
    # vh: (sz_b, len_k, n_head*d_v)
    sz_b, len_q, _ = qh.shape
    len_k = kh.shape[1]
    n_qk = n_head * d_k
    n_v = n_head * d_v

    # Pick the q tile so the double-buffered attn block (the dominant VMEM
    # resident: 2 * n_head * tq * len_k * 4 B) stays under ~8 MiB.
    budget = 8 * 1024 * 1024
    max_tq = max(8, budget // (2 * n_head * len_k * 4))
    tq = _pick_tile(len_q, min(256, max_tq), 8)

    kernel = functools.partial(
        _attention_kernel,
        n_head=n_head, d_k=d_k, d_v=d_v, inv_temp=1.0 / temperature,
    )
    out, attn = pl.pallas_call(
        kernel,
        grid=(sz_b, len_q // tq),
        in_specs=[
            pl.BlockSpec((1, tq, n_qk), lambda b, qi: (b, qi, 0)),
            pl.BlockSpec((1, len_k, n_qk), lambda b, qi: (b, 0, 0)),
            pl.BlockSpec((1, len_k, n_v), lambda b, qi: (b, 0, 0)),
        ],
        out_specs=[
            pl.BlockSpec((1, tq, n_v), lambda b, qi: (b, qi, 0)),
            # attn emitted in the PyTorch-friendly layout -> the wrapper only
            # needs a free reshape (no HBM transpose of the O(S^2) tensor).
            pl.BlockSpec((n_head, 1, tq, len_k), lambda b, qi: (0, b, qi, 0)),
        ],
        out_shape=[
            jax.ShapeDtypeStruct((sz_b, len_q, n_v), jnp.float32),
            jax.ShapeDtypeStruct((n_head, sz_b, len_q, len_k), jnp.float32),
        ],
        compiler_params=pltpu.CompilerParams(
            dimension_semantics=("parallel", "parallel"),
            vmem_limit_bytes=_VMEM_LIMIT,
        ),
    )(qh, kh, vh)
    return out, attn


# ---------------------------------------------------------------------------
# Kernel 3: fc projection + residual add + LayerNorm (tiled over rows)
# ---------------------------------------------------------------------------
def _fc_ln_kernel(x_ref, w_ref, b_ref, res_ref, g_ref, beta_ref, o_ref, *, eps):
    y = jnp.dot(x_ref[...].astype(jnp.bfloat16),
                w_ref[...].astype(jnp.bfloat16),
                preferred_element_type=jnp.float32)
    y = y + b_ref[...] + res_ref[...]
    mean = jnp.mean(y, axis=-1, keepdims=True)
    var = jnp.mean(jnp.square(y - mean), axis=-1, keepdims=True)  # biased (PyTorch)
    o_ref[...] = ((y - mean) * lax.rsqrt(var + eps) * g_ref[...]
                  + beta_ref[...]).astype(o_ref.dtype)


def fc_residual_layernorm(x2d, w, b, residual2d, gamma, beta, eps=1e-5, *, tm=256):
    M, K = x2d.shape
    N = w.shape[1]
    tm = _pick_tile(M, tm, 8)
    kernel = functools.partial(_fc_ln_kernel, eps=eps)
    return pl.pallas_call(
        kernel,
        grid=(M // tm,),
        in_specs=[
            pl.BlockSpec((tm, K), lambda i: (i, 0)),
            pl.BlockSpec((K, N), lambda i: (0, 0)),     # bf16 W resident in VMEM
            pl.BlockSpec((1, N), lambda i: (0, 0)),
            pl.BlockSpec((tm, N), lambda i: (i, 0)),
            pl.BlockSpec((1, N), lambda i: (0, 0)),
            pl.BlockSpec((1, N), lambda i: (0, 0)),
        ],
        out_specs=pl.BlockSpec((tm, N), lambda i: (i, 0)),
        out_shape=jax.ShapeDtypeStruct((M, N), jnp.float32),
        compiler_params=pltpu.CompilerParams(
            dimension_semantics=("parallel",),
            vmem_limit_bytes=_VMEM_LIMIT,
        ),
    )(x2d, w, b, residual2d, gamma, beta)


# ---------------------------------------------------------------------------
# MultiHeadAttention wrapper (glue in plain JAX: reshapes only, no transposes
# of Q/K/V/O/attn through HBM — head indexing lives inside the kernels)
# ---------------------------------------------------------------------------
class MultiHeadAttentionPallas:
    def __init__(self, n_head, d_model, d_k, d_v, key):
        self.n_head = n_head
        self.d_model = d_model
        self.d_k = d_k
        self.d_v = d_v
        self.temperature = float(d_k) ** 0.5

        ks = jax.random.split(key, 8)
        std_qk = (2.0 / (d_model + d_k)) ** 0.5
        std_v = (2.0 / (d_model + d_v)) ** 0.5
        # f32 master weights, stored as (in, out)
        self.w_qs = jax.random.normal(ks[0], (d_model, n_head * d_k), jnp.float32) * std_qk
        self.w_ks = jax.random.normal(ks[1], (d_model, n_head * d_k), jnp.float32) * std_qk
        self.w_vs = jax.random.normal(ks[2], (d_model, n_head * d_v), jnp.float32) * std_v
        bound = 1.0 / (d_model ** 0.5)
        self.b_qs = jax.random.uniform(ks[3], (1, n_head * d_k), jnp.float32, -bound, bound)
        self.b_ks = jax.random.uniform(ks[4], (1, n_head * d_k), jnp.float32, -bound, bound)
        self.b_vs = jax.random.uniform(ks[5], (1, n_head * d_v), jnp.float32, -bound, bound)
        # fc: xavier_normal_ -> std sqrt(2/(in+out))
        std_fc = (2.0 / (n_head * d_v + d_model)) ** 0.5
        self.w_fc = jax.random.normal(ks[6], (n_head * d_v, d_model), jnp.float32) * std_fc
        bound_fc = 1.0 / ((n_head * d_v) ** 0.5)
        self.b_fc = jax.random.uniform(ks[7], (1, d_model), jnp.float32, -bound_fc, bound_fc)
        # LayerNorm params
        self.ln_gamma = jnp.ones((1, d_model), jnp.float32)
        self.ln_beta = jnp.zeros((1, d_model), jnp.float32)

        # bf16 weight copies fed to the kernels (one-time cast; halves weight
        # HBM traffic and VMEM residency).  Fused variants: one HBM read of x
        # for self-attention, one shared read of k for k==v.
        self.w_qs_b = self.w_qs.astype(jnp.bfloat16)
        self.w_ks_b = self.w_ks.astype(jnp.bfloat16)
        self.w_vs_b = self.w_vs.astype(jnp.bfloat16)
        self.w_fc_b = self.w_fc.astype(jnp.bfloat16)
        self.w_qkv_b = jnp.concatenate([self.w_qs, self.w_ks, self.w_vs],
                                       axis=1).astype(jnp.bfloat16)
        self.b_qkv = jnp.concatenate([self.b_qs, self.b_ks, self.b_vs], axis=1)
        self.w_kv_b = jnp.concatenate([self.w_ks, self.w_vs], axis=1).astype(jnp.bfloat16)
        self.b_kv = jnp.concatenate([self.b_ks, self.b_vs], axis=1)

    def __call__(self, q, k, v, mask=None):
        # NOTE: `mask` is accepted but unused — the reference
        # ScaledDotProductAttention.forward never applies its mask argument.
        n_head, d_k, d_v, d_model = self.n_head, self.d_k, self.d_v, self.d_model
        sz_b, len_q, _ = q.shape
        _, len_k, _ = k.shape
        residual = q
        n_qk = n_head * d_k
        n_v = n_head * d_v

        q2 = q.reshape(sz_b * len_q, d_model)
        k2 = k.reshape(sz_b * len_k, d_model)
        v2 = v.reshape(sz_b * len_k, d_model)

        # --- QKV projections (tiled Pallas matmul; fused when inputs alias) ---
        if (q is k) and (k is v):
            qkv = linear(q2, self.w_qkv_b, self.b_qkv)
            qp = qkv[:, :n_qk]
            kp = qkv[:, n_qk:2 * n_qk]
            vp = qkv[:, 2 * n_qk:]
        else:
            qp = linear(q2, self.w_qs_b, self.b_qs)
            if k is v:
                kv = linear(k2, self.w_kv_b, self.b_kv)
                kp, vp = kv[:, :n_qk], kv[:, n_qk:]
            else:
                kp = linear(k2, self.w_ks_b, self.b_ks)
                vp = linear(v2, self.w_vs_b, self.b_vs)

        # free reshapes only — no head transposes through HBM
        qh = qp.reshape(sz_b, len_q, n_qk)
        kh = kp.reshape(sz_b, len_k, n_qk)
        vh = vp.reshape(sz_b, len_k, n_v)

        # --- attention (Pallas kernel, grid over (batch, q-tile)) ---
        out, attn_hb = attention(qh, kh, vh, n_head=n_head, d_k=d_k, d_v=d_v,
                                 temperature=self.temperature)

        # out is already (sz_b, len_q, n_head*d_v): exactly the fc input layout
        out2 = out.reshape(sz_b * len_q, n_v)

        # --- fc + residual + layernorm (Pallas kernel) ---
        final = fc_residual_layernorm(
            out2, self.w_fc_b, self.b_fc,
            residual.reshape(sz_b * len_q, d_model),
            self.ln_gamma, self.ln_beta)
        final = final.reshape(sz_b, len_q, d_model)

        # attn already in (n_head, sz_b, len_q, len_k): free reshape to the
        # PyTorch (n_head*sz_b, len_q, len_k) layout, index h*sz_b + b.
        attn = attn_hb.reshape(n_head * sz_b, len_q, len_k)
        return final, attn


# ---------------------------------------------------------------------------
# Pure-JAX reference (mirrors the PyTorch forward, dropout as identity).
# All matmuls at Precision.HIGHEST so the gold values are backend-stable.
# ---------------------------------------------------------------------------
def reference_forward(mha, q, k, v):
    n_head, d_k, d_v, d_model = mha.n_head, mha.d_k, mha.d_v, mha.d_model
    sz_b, len_q, _ = q.shape
    len_k = k.shape[1]
    residual = q
    qp = jnp.dot(q.reshape(-1, d_model), mha.w_qs, precision=_HIGHEST) + mha.b_qs
    kp = jnp.dot(k.reshape(-1, d_model), mha.w_ks, precision=_HIGHEST) + mha.b_ks
    vp = jnp.dot(v.reshape(-1, d_model), mha.w_vs, precision=_HIGHEST) + mha.b_vs
    qh = qp.reshape(sz_b, len_q, n_head, d_k).transpose(2, 0, 1, 3).reshape(-1, len_q, d_k)
    kh = kp.reshape(sz_b, len_k, n_head, d_k).transpose(2, 0, 1, 3).reshape(-1, len_k, d_k)
    vh = vp.reshape(sz_b, len_k, n_head, d_v).transpose(2, 0, 1, 3).reshape(-1, len_k, d_v)
    s = jnp.einsum("bqd,bkd->bqk", qh, kh, precision=_HIGHEST) / mha.temperature
    p = jax.nn.softmax(s, axis=2)
    p = jax.nn.softmax(p, axis=2)
    o = jnp.einsum("bqk,bkd->bqd", p, vh, precision=_HIGHEST)
    o = o.reshape(n_head, sz_b, len_q, d_v).transpose(1, 2, 0, 3).reshape(sz_b * len_q, -1)
    y = (jnp.dot(o, mha.w_fc, precision=_HIGHEST) + mha.b_fc
         + residual.reshape(sz_b * len_q, d_model))
    mean = jnp.mean(y, axis=-1, keepdims=True)
    var = jnp.mean((y - mean) ** 2, axis=-1, keepdims=True)
    y = (y - mean) / jnp.sqrt(var + 1e-5) * mha.ln_gamma + mha.ln_beta
    return y.reshape(sz_b, len_q, d_model), p


if __name__ == "__main__":
    key = jax.random.PRNGKey(0)
    k_params, k_x, k_q, k_kv, k_params2 = jax.random.split(key, 5)

    # bf16 MXU inputs (f32 accumulate) vs an f32-exact reference: allow ~1e-2.
    TOL = dict(atol=2e-2, rtol=2e-2)

    # --- small config (matches the module's toy shapes) ---
    n_head, d_model, d_k, d_v = 4, 32, 8, 8
    sz_b, seq = 2, 8
    mha = MultiHeadAttentionPallas(n_head, d_model, d_k, d_v, k_params)

    x = jax.random.normal(k_x, (sz_b, seq, d_model), jnp.float32)

    # self-attention: exercises the fused QKV projection path
    out, attn = mha(x, x, x)
    out = jax.block_until_ready(out)
    attn = jax.block_until_ready(attn)
    ref_out, ref_attn = reference_forward(mha, x, x, x)
    assert out.shape == (sz_b, seq, d_model)
    assert attn.shape == (n_head * sz_b, seq, seq)
    assert jnp.allclose(out, ref_out, **TOL)
    assert jnp.allclose(attn, ref_attn, **TOL)

    # cross-attention with shared K/V: exercises the fused K/V projection path
    qx = jax.random.normal(k_q, (sz_b, seq, d_model), jnp.float32)
    kvx = jax.random.normal(k_kv, (sz_b, seq, d_model), jnp.float32)
    out2, attn2 = mha(qx, kvx, kvx)
    out2 = jax.block_until_ready(out2)
    ref_out2, ref_attn2 = reference_forward(mha, qx, kvx, kvx)
    assert jnp.allclose(out2, ref_out2, **TOL)
    assert jnp.allclose(attn2, ref_attn2, **TOL)

    # --- larger config: exercises the tiled matmul grids / q-tiled attention ---
    n_head2, d_model2, d_k2, d_v2 = 8, 256, 32, 32
    sz_b2, seq2 = 2, 128
    mha2 = MultiHeadAttentionPallas(n_head2, d_model2, d_k2, d_v2, k_params2)
    x2 = jax.random.normal(jax.random.PRNGKey(1), (sz_b2, seq2, d_model2), jnp.float32)
    out3, attn3 = mha2(x2, x2, x2)
    out3 = jax.block_until_ready(out3)
    attn3 = jax.block_until_ready(attn3)
    ref_out3, ref_attn3 = reference_forward(mha2, x2, x2, x2)
    assert out3.shape == (sz_b2, seq2, d_model2)
    assert attn3.shape == (n_head2 * sz_b2, seq2, seq2)
    assert jnp.allclose(out3, ref_out3, **TOL)
    assert jnp.allclose(attn3, ref_attn3, **TOL)

    print("KERNEL_OK")
</pallas_src>

<mosaic_0001>
module attributes {stable_mosaic.version = 11 : i64} {
  func.func @_matmul_bias_kernel(%arg0: i32, %arg1: i32, %arg2: i32, %arg3: memref<16x32xf32, #tpu.memory_space<vmem>>, %arg4: memref<32x96xbf16, #tpu.memory_space<vmem>>, %arg5: memref<1x96xf32, #tpu.memory_space<vmem>>, %arg6: memref<16x96xf32, #tpu.memory_space<vmem>>, %arg7: memref<16x96xf32, #tpu.memory_space<vmem>>) attributes {dimension_semantics = [#tpu.dimension_semantics<parallel>, #tpu.dimension_semantics<parallel>, #tpu.dimension_semantics<arbitrary>], iteration_bounds = array<i64: 1, 1, 1>, scalar_prefetch = 0 : i64, scratch_operands = 1 : i64, tpu.core_type = #tpu.core_type<tc>, window_params = [{transform_indices = @transform_0, window_bounds = array<i64: 16, 32>}, {transform_indices = @transform_1, window_bounds = array<i64: 32, 96>}, {transform_indices = @transform_2, window_bounds = array<i64: 1, 96>}, {transform_indices = @transform_3, window_bounds = array<i64: 16, 96>}]} {
    %c0_i32 = arith.constant 0 : i32
    %0 = arith.cmpi eq, %arg2, %c0_i32 : i32
    %1 = arith.extui %0 : i1 to i32
    %c0_i32_0 = arith.constant 0 : i32
    %2 = arith.cmpi ne, %1, %c0_i32_0 : i32
    scf.if %2 {
      %cst_10 = arith.constant 0.000000e+00 : f32
      %13 = vector.broadcast %cst_10 : f32 to vector<16x96xf32>
      %c0_11 = arith.constant 0 : index
      %c0_12 = arith.constant 0 : index
      %14 = vector.load %arg7[%c0_11, %c0_12] : memref<16x96xf32, #tpu.memory_space<vmem>>, vector<16x96xf32>
      tpu.vector_store %arg7[%c0_11, %c0_12], %13 {strides = array<i32>} : memref<16x96xf32, #tpu.memory_space<vmem>>, vector<16x96xf32>,
    } else {
    }
    %c0 = arith.constant 0 : index
    %c0_1 = arith.constant 0 : index
    %3 = vector.load %arg7[%c0, %c0_1] : memref<16x96xf32, #tpu.memory_space<vmem>>, vector<16x96xf32>
    %c0_2 = arith.constant 0 : index
    %c0_3 = arith.constant 0 : index
    %4 = vector.load %arg3[%c0_2, %c0_3] : memref<16x32xf32, #tpu.memory_space<vmem>>, vector<16x32xf32>
    %5 = arith.truncf %4 : vector<16x32xf32> to vector<16x32xbf16>
    %c0_4 = arith.constant 0 : index
    %c0_5 = arith.constant 0 : index
    %6 = vector.load %arg4[%c0_4, %c0_5] : memref<32x96xbf16, #tpu.memory_space<vmem>>, vector<32x96xbf16>
    %cst = arith.constant dense<0.000000e+00> : vector<16x96xf32>
    %7 = tpu.matmul %5, %6, %cst {dimension_numbers = #tpu.dot_dimension_numbers<[1], [0], [0], [1], [0, 0, 1, 1], [], []>} : vector<16x32xbf16>, vector<32x96xbf16>, vector<16x96xf32> -> vector<16x96xf32>
    %8 = arith.addf %3, %7 : vector<16x96xf32>
    %c0_6 = arith.constant 0 : index
    %c0_7 = arith.constant 0 : index
    %9 = vector.load %arg7[%c0_6, %c0_7] : memref<16x96xf32, #tpu.memory_space<vmem>>, vector<16x96xf32>
    tpu.vector_store %arg7[%c0_6, %c0_7], %8 {strides = array<i32>} : memref<16x96xf32, #tpu.memory_space<vmem>>, vector<16x96xf32>,
    %c0_i32_8 = arith.constant 0 : i32
    %10 = arith.cmpi eq, %arg2, %c0_i32_8 : i32
    %11 = arith.extui %10 : i1 to i32
    %c0_i32_9 = arith.constant 0 : i32
    %12 = arith.cmpi ne, %11, %c0_i32_9 : i32
    scf.if %12 {
      %c0_10 = arith.constant 0 : index
      %c0_11 = arith.constant 0 : index
      %13 = vector.load %arg7[%c0_10, %c0_11] : memref<16x96xf32, #tpu.memory_space<vmem>>, vector<16x96xf32>
      %c0_12 = arith.constant 0 : index
      %c0_13 = arith.constant 0 : index
      %14 = vector.load %arg5[%c0_12, %c0_13] : memref<1x96xf32, #tpu.memory_space<vmem>>, vector<1x96xf32>
      %15 = vector.broadcast %14 : vector<1x96xf32> to vector<16x96xf32>
      %16 = arith.addf %13, %15 : vector<16x96xf32>
      %c0_14 = arith.constant 0 : index
      %c0_15 = arith.constant 0 : index
      %17 = vector.load %arg6[%c0_14, %c0_15] : memref<16x96xf32, #tpu.memory_space<vmem>>, vector<16x96xf32>
      tpu.vector_store %arg6[%c0_14, %c0_15], %16 {strides = array<i32>} : memref<16x96xf32, #tpu.memory_space<vmem>>, vector<16x96xf32>,
    } else {
    }
    return
  }
  func.func @transform_0(%arg0: i32, %arg1: i32, %arg2: i32) -> (i32, i32) {
    %c0_i32 = arith.constant 0 : i32
    return %arg0, %arg2 : i32, i32
  }
  func.func @transform_1(%arg0: i32, %arg1: i32, %arg2: i32) -> (i32, i32) {
    %c0_i32 = arith.constant 0 : i32
    return %arg2, %arg1 : i32, i32
  }
  func.func @transform_2(%arg0: i32, %arg1: i32, %arg2: i32) -> (i32, i32) {
    %c0_i32 = arith.constant 0 : i32
    %c0_i32_0 = arith.constant 0 : i32
    return %c0_i32, %arg1 : i32, i32
  }
  func.func @transform_3(%arg0: i32, %arg1: i32, %arg2: i32) -> (i32, i32) {
    %c0_i32 = arith.constant 0 : i32
    return %arg0, %arg1 : i32, i32
  }
}

</mosaic_0001>

<bundles_post_ra>
// kernel: tpu_custom_call.1
= control target key start
LH: loop header
LB: loop body
LE: loop exit
PB: predicated region body
PF: predicated region fallthrough
CT: control target
= control target key end

     0   :  { %8 = vsyncpa [#allocation4], 0  ;;  %s334_s0 = inlined_call_operand.hbm [shape: f32[16,32], index: 0, kind: input, shape index: {}]   ;;  %s335_s1 = inlined_call_operand.hbm [shape: bf16[32,96], index: 1, kind: input, shape index: {}]   ;;  %s336_s2 = inlined_call_operand.vmem [shape: f32[1,96], index: 2, kind: input, shape index: {}]   ;;  %s337_s3 = inlined_call_operand.hbm [shape: f32[16,96], index: 3, kind: output, shape index: {}]  }
   0x1   :  { %9 = vsyncpa [#allocation7], 0 }
   0x2   :  { %10 = vsyncpa [#allocation5], 0  ;;  %s254_s12 = smov [#allocation3]   ;;  %s182_s16 = scalar_lea.hbm %s334_s0, 256 }
   0x3   :  { %s16_s13 = sshll.u32 %s254_s12, 4  ;;  %p183_p0 = scmp.ne.s32.totalorder %s334_s0, %s182_s16  ;;  %s17_s13 = int_to_ptr.vmem [resolvable:$true] %s16_s13 }
   0x4   :  { %p186_p1 = scmp.lt.u32.totalorder %s182_s16, %s334_s0 }
   0x6   :  { %p188_p2 = pnand %p186_p1, %p183_p0 }
   0x8   :  { %191 = shalt.err (!%p188_p2)
}
   0x9   :  { %s192_s21 = scalar_lea.vmem %s17_s13, 256  ;;  %p197_p4 = scmp.lt.s32.totalorder %s17_s13, %s17_s13 }
   0xa   :  { %p193_p3 = scmp.ne.s32.totalorder %s17_s13, %s192_s21  ;;  %p198_p5 = scmp.lt.s32.totalorder %s192_s21, %s192_s21 }
   0xc   :  { %p199_p6 = por %p198_p5, %p197_p4 }
   0xe   :  { %p200_p7 = pnand %p199_p6, %p193_p3 }
  0x10   :  { %203 = shalt.err (!%p200_p7)
}
  0x11   :  { %s255_s22 = smov 128   ;;  %s256_s23 = smov 8  }
  0x12   :  { %22 = dma.hbm_to_vmem [thread:$0]  %s334_s0, 256, %s17_s13, [#allocation4], %s255_s22, %s255_s22, %s256_s23  }
  0x13   :  { %s257_s26 = smov [#allocation6]   ;;  %s204_s30 = scalar_lea.hbm %s335_s1, 256 }
  0x14   :  { %s28_s27 = sshll.u32 %s257_s26, 4  ;;  %p205_p8 = scmp.ne.s32.totalorder %s335_s1, %s204_s30  ;;  %s29_s27 = int_to_ptr.vmem [resolvable:$true] %s28_s27 }
  0x15   :  { %p208_p9 = scmp.lt.u32.totalorder %s204_s30, %s335_s1 }
  0x17   :  { %p210_p10 = pnand %p208_p9, %p205_p8 }
  0x19   :  { %213 = shalt.err (!%p210_p10)
}
  0x1a   :  { %s214_s8 = scalar_lea.vmem %s29_s27, 256  ;;  %p219_p12 = scmp.lt.s32.totalorder %s29_s27, %s29_s27 }
  0x1b   :  { %p215_p11 = scmp.ne.s32.totalorder %s29_s27, %s214_s8  ;;  %p220_p13 = scmp.lt.s32.totalorder %s214_s8, %s214_s8 }
  0x1d   :  { %p221_p0 = por %p220_p13, %p219_p12 }
  0x1f   :  { %p222_p1 = pnand %p221_p0, %p215_p11 }
  0x21   :  { %225 = shalt.err (!%p222_p1)
}
  0x22   :  { %s258_s0 = smov 64   ;;  %s259_s9 = smov 4  }
  0x23   :  { %34 = dma.hbm_to_vmem [thread:$0]  %s335_s1, 256, %s29_s27, [#allocation7], %s258_s0, %s258_s0, %s259_s9  }
  0x24   :  { %248 = dma.done.wait [#allocation4], 256  }
  0x25   :  { %249 = vsyncadd [#allocation4], 4294967040 }
  0x26   :  { %250 = dma.done.wait [#allocation7], 256  }
  0x27   :  { %251 = vsyncadd [#allocation7], 4294967040  ;;  %vm48_vm0 = vcmask 785408   ;;  %v260_v0 = vmov 0.0   ;;  %vm261_vm1 = vmmov 0   ;;  %v180_v1 = vld [vmem:[#allocation6] sm:$0xff]  }
  0x28   :  { %49 = vst.msk [vmem:[#allocation2] sm:$0xff] %vm48_vm0, %v260_v0  ;;  %50 = vst.msk [vmem:[#allocation2 + $0x8] sm:$0xff] %vm48_vm0, %v260_v0  ;;  %163 = vmatprep.subr.bf16.mxu0 %v260_v0  ;;  %167 = vmatprep.mubr.msk.bf16.mxu0 %vm261_vm1, %v260_v0  ;;  %v181_v2 = vld [vmem:[#allocation6 + $0x8] sm:$0xff]   ;;  %v53_v3 = vld [vmem:[#allocation3] sm:$0xff]  ;;  %vm72_vm2 = vcmask 261120   ;;  %s262_s13 = smov [#allocation8]  }
  0x29   :  { %164 = vmatpush3.bf16.msra.mxu0 %v180_v1  ;;  %v54_v4 = vld [vmem:[#allocation3 + $0x8] sm:$0xff]  ;;  %v159_v14 = vld [vmem:[%s336_s2] ss:$0 sm:$0xff]  ;;  %s143_s14 = sshll.u32 %s262_s13, 4  ;;  %s144_s14 = int_to_ptr.vmem [resolvable:$true] %s143_s14 }
  0x2a   :  { %165 = vmatprep.subr.bf16.mxu0 %v260_v0  ;;  %v55_v5 = vpack.c.bf16 %v54_v4, %v53_v3  ;;  %s226_s15 = scalar_lea.vmem %s144_s14, 256  ;;  %p231_p3 = scmp.lt.s32.totalorder %s144_s14, %s144_s14 }
  0x2b   :  { %p227_p2 = scmp.ne.s32.totalorder %s144_s14, %s226_s15  ;;  %p232_p4 = scmp.lt.s32.totalorder %s226_s15, %s226_s15 }
  0x2d   :  { %166 = vmatpush3.bf16.msra.mxu0 %v181_v2  ;;  %p233_p5 = por %p232_p4, %p231_p3 }
  0x2f   :  { %v51_v6 = vld [vmem:[#allocation2] sm:$0xff]  ;;  %v52_v8 = vld [vmem:[#allocation2 + $0x8] sm:$0xff]  ;;  %p234_p6 = pnand %p233_p5, %p227_p2 }
  0x30   :  { %168 = vmatmul.mubr.msk.bf16.vlgmr.msra.gmra.mrb[0].mxu0 %vm72_vm2, %v55_v5 }
 0x103   :  { %v110_v7 = vpop.f32.mrb[0].mxu0 }
 0x104   :  { %v117_v9 = vadd.f32 %v110_v7, %v51_v6  ;;  %v169_v10 = vpop.f32.mrb[1].mxu0 }
 0x105   :  { %v113_v11 = vpop.f32.mrb[2].mxu0 }
 0x106   :  { %120 = vst.msk [vmem:[#allocation2] sm:$0xff] %vm48_vm0, %v117_v9  ;;  %v118_v12 = vadd.f32 %v113_v11, %v52_v8  ;;  %v170_v13 = vpop.f32.mrb[3].mxu0 }
 0x108   :  { %121 = vst.msk [vmem:[#allocation2 + $0x8] sm:$0xff] %vm48_vm0, %v118_v12 }
 0x10d   :  { %v125_v15 = vld [vmem:[#allocation2] sm:$0xff] }
 0x10e   :  { %v134_v16 = vadd.f32 %v159_v14, %v125_v15 }
 0x10f   :  { %v126_v17 = vld [vmem:[#allocation2 + $0x8] sm:$0xff] }
 0x110   :  { %v135_v18 = vadd.f32 %v159_v14, %v126_v17  ;;  %136 = vst.msk [vmem:[#allocation8] sm:$0xff] %vm48_vm0, %v134_v16 }
 0x112   :  { %137 = vst.msk [vmem:[#allocation8 + $0x8] sm:$0xff] %vm48_vm0, %v135_v18 }
 0x113   :  { %237 = shalt.err (!%p234_p6)
}
 0x114   :  { %s238_s17 = scalar_lea.hbm %s337_s3, 256 }
 0x115   :  { %p239_p7 = scmp.ne.s32.totalorder %s337_s3, %s238_s17  ;;  %p242_p8 = scmp.lt.u32.totalorder %s238_s17, %s337_s3 }
 0x117   :  { %p244_p9 = pnand %p242_p8, %p239_p7 }
 0x119   :  { %247 = shalt.err (!%p244_p9)
}
 0x11a   :  { %149 = dma.vmem_to_hbm [thread:$0]  %s144_s14, 256, %s337_s3, [#allocation5], %s255_s22, %s255_s22, %s256_s23  }
 0x11b   :  { %252 = dma.done.wait [#allocation5], 256  }
 0x11c   :  { %253 = vsyncadd [#allocation5], 4294967040 }
 0x11d   :  { %153 = vsyncpa [#allocation4], 1 }
 0x11e   :  { %154 = vsyncpa [#allocation7], 1 }
 0x11f   :  { %155 = vsyncpa [#allocation5], 1 }

</bundles_post_ra>
